<compile_context>
chip_gen: v7x
topology: tpu7x:2x2x1
jax: 0.10.0
libtpu: 0.0.40
codegen_flags: <defaults>
</compile_context>

<pallas_src>
import functools

import jax
import jax.numpy as jnp
from jax.experimental import pallas as pl
from jax.experimental.pallas import tpu as pltpu

LANE = 128  # TPU lane width (fast / last axis of a vreg)


def _round_up(v, m):
    return ((v + m - 1) // m) * m


def net_kernel(x_ref, w1_ref, b1_ref, w2_ref, b2_ref, w3_ref, b3_ref, o_ref):
    """One batch tile in transposed layout: columns = batch (lane axis)."""
    x = x_ref[...]                                                   # (n_states, tb)
    # fc1 + relu   (weights are PyTorch-native (out, in), so W @ X == Linear)
    h1 = jnp.dot(w1_ref[...], x, preferred_element_type=jnp.float32) + b1_ref[...]
    h1 = jnp.maximum(h1, 0.0)                                        # (n_hiddens, tb)
    # fc2 + relu
    h2 = jnp.dot(w2_ref[...], h1, preferred_element_type=jnp.float32) + b2_ref[...]
    h2 = jnp.maximum(h2, 0.0)                                        # (n_hiddens, tb)
    # fc3
    logits = jnp.dot(w3_ref[...], h2, preferred_element_type=jnp.float32) + b3_ref[...]
    # numerically-stable softmax over the action axis (rows here == dim=1 of
    # the original (B, n_actions) layout).  Exact divide so rows sum to 1.
    m = jnp.max(logits, axis=0, keepdims=True)
    e = jnp.exp(logits - m)
    denom = jnp.sum(e, axis=0, keepdims=True)
    o_ref[...] = (e / denom).astype(o_ref.dtype)


def net_forward(x, params, tile_b=8192):
    """Batched policy forward.  x: (B, n_states) -> (B, n_actions) probs."""
    w1, b1, w2, b2, w3, b3 = params
    B, n_states = x.shape
    n_hiddens = w1.shape[0]
    n_actions = w3.shape[0]

    # --- batch tiling (lane axis) -------------------------------------------
    b_pad = _round_up(B, LANE)                       # lane-align only (<=127 cols)
    tb = _round_up(min(int(tile_b), b_pad), LANE)    # tile: multiple of 128 lanes
    if b_pad >= 2 * LANE:
        # v7x: guarantee >=2 grid steps so the "parallel" batch axis feeds
        # both TensorCores; harmless on single-TC v5e/v6e.
        tb = min(tb, _round_up(pl.cdiv(b_pad, 2), LANE))
    grid = (pl.cdiv(b_pad, tb),)                     # ragged tail masked by Pallas

    # Layout plumbing only: batch -> lane axis.  The small lane-alignment pad
    # is folded into this same transpose copy (fuses under jit), so there is
    # no separate full-batch pad pass over x in HBM.
    x_t = jnp.zeros((n_states, b_pad), x.dtype).at[:, :B].set(x.T)

    # Advisory cost for XLA's scheduler (3 matmuls + exp per row).
    flops = 2 * b_pad * (n_states * n_hiddens + n_hiddens * n_hiddens
                         + n_hiddens * n_actions)
    bytes_accessed = 4 * (
        b_pad * n_states + b_pad * n_actions
        + n_states * n_hiddens + n_hiddens
        + n_hiddens * n_hiddens + n_hiddens
        + n_hiddens * n_actions + n_actions
    )
    cost = pl.CostEstimate(flops=flops,
                           transcendentals=b_pad * n_actions,
                           bytes_accessed=bytes_accessed)

    def resident(arr):
        # Whole array, same block index every grid step -> stays VMEM-resident
        # (Pallas skips re-DMA when the block index is unchanged).  Single
        # buffering (pl.Buffered(1)) was considered per review, but the ~5 KB
        # saving is noise here and default buffering is the safest lowering.
        return pl.BlockSpec(arr.shape, lambda i: (0, 0))

    out_t = pl.pallas_call(
        net_kernel,
        out_shape=jax.ShapeDtypeStruct((n_actions, b_pad), jnp.float32),
        grid=grid,
        in_specs=[
            pl.BlockSpec((n_states, tb), lambda i: (0, i)),   # x: streamed over batch
            resident(w1), resident(b1),
            resident(w2), resident(b2),
            resident(w3), resident(b3),
        ],
        out_specs=pl.BlockSpec((n_actions, tb), lambda i: (0, i)),   # lane-dense stores
        compiler_params=pltpu.CompilerParams(
            dimension_semantics=("parallel",),   # shard batch grid across TCs (v7x)
        ),
        cost_estimate=cost,
    )(x_t, w1, b1, w2, b2, w3, b3)

    # Back to the module's (B, n_actions) layout; padded columns dropped.
    return out_t[:, :B].T


def init_params(key, n_states, n_actions, n_hiddens):
    # PyTorch nn.Linear default init: U(-1/sqrt(fan_in), 1/sqrt(fan_in)).
    # Weights kept in PyTorch-native (out_features, in_features) layout,
    # biases as (out_features, 1) columns for the transposed kernel layout.
    def linear(key, fan_in, fan_out):
        kw, kb = jax.random.split(key)
        bound = 1.0 / jnp.sqrt(fan_in)
        w = jax.random.uniform(kw, (fan_out, fan_in), jnp.float32, -bound, bound)
        b = jax.random.uniform(kb, (fan_out, 1), jnp.float32, -bound, bound)
        return w, b

    k1, k2, k3 = jax.random.split(key, 3)
    w1, b1 = linear(k1, n_states, n_hiddens)
    w2, b2 = linear(k2, n_hiddens, n_hiddens)
    w3, b3 = linear(k3, n_hiddens, n_actions)
    return w1, b1, w2, b2, w3, b3


def reference_forward(x, params):
    w1, b1, w2, b2, w3, b3 = params
    h1 = jnp.maximum(x @ w1.T + b1.T, 0.0)
    h2 = jnp.maximum(h1 @ w2.T + b2.T, 0.0)
    logits = h2 @ w3.T + b3.T
    return jax.nn.softmax(logits, axis=1)


if __name__ == "__main__":
    n_states, n_actions, n_hiddens = 4, 2, 32

    key = jax.random.PRNGKey(0)
    kx1, kx2, kp = jax.random.split(key, 3)
    params = init_params(kp, n_states, n_actions, n_hiddens)

    fwd = jax.jit(functools.partial(net_forward, tile_b=8192))

    # Case 1: small ragged batch (pads to one 128-lane tile, grid=(1,)).
    x1 = jax.random.normal(kx1, (20, n_states), dtype=jnp.float32)
    out1 = jax.block_until_ready(fwd(x1, params))
    ref1 = reference_forward(x1, params)
    assert out1.shape == (20, n_actions)
    assert jnp.allclose(out1, ref1, atol=1e-5, rtol=1e-5)
    assert jnp.allclose(jnp.sum(out1, axis=1), 1.0, atol=1e-5)

    # Case 2: lane-aligned batch that splits into a 2-step "parallel" grid
    # (exercises the v7x dual-TensorCore path; tb is capped to b_pad // 2).
    x2 = jax.random.normal(kx2, (256, n_states), dtype=jnp.float32)
    out2 = jax.block_until_ready(fwd(x2, params))
    ref2 = reference_forward(x2, params)
    assert out2.shape == (256, n_actions)
    assert jnp.allclose(out2, ref2, atol=1e-5, rtol=1e-5)
    assert jnp.allclose(jnp.sum(out2, axis=1), 1.0, atol=1e-5)

    print("KERNEL_OK")
</pallas_src>

<mosaic_0001>
module attributes {stable_mosaic.version = 11 : i64} {
  func.func @net_kernel(%arg0: i32, %arg1: memref<4x128xf32, #tpu.memory_space<vmem>>, %arg2: memref<32x4xf32, #tpu.memory_space<vmem>>, %arg3: memref<32x1xf32, #tpu.memory_space<vmem>>, %arg4: memref<32x32xf32, #tpu.memory_space<vmem>>, %arg5: memref<32x1xf32, #tpu.memory_space<vmem>>, %arg6: memref<2x32xf32, #tpu.memory_space<vmem>>, %arg7: memref<2x1xf32, #tpu.memory_space<vmem>>, %arg8: memref<2x128xf32, #tpu.memory_space<vmem>>) attributes {dimension_semantics = [#tpu.dimension_semantics<parallel>], iteration_bounds = array<i64: 1>, scalar_prefetch = 0 : i64, scratch_operands = 0 : i64, tpu.core_type = #tpu.core_type<tc>, window_params = [{transform_indices = @transform_0, window_bounds = array<i64: 4, 128>}, {pipeline_mode = #tpu.pipeline_mode<synchronous>, transform_indices = @transform_1, window_bounds = array<i64: 32, 4>}, {pipeline_mode = #tpu.pipeline_mode<synchronous>, transform_indices = @transform_2, window_bounds = array<i64: 32, 1>}, {pipeline_mode = #tpu.pipeline_mode<synchronous>, transform_indices = @transform_3, window_bounds = array<i64: 32, 32>}, {pipeline_mode = #tpu.pipeline_mode<synchronous>, transform_indices = @transform_4, window_bounds = array<i64: 32, 1>}, {pipeline_mode = #tpu.pipeline_mode<synchronous>, transform_indices = @transform_5, window_bounds = array<i64: 2, 32>}, {pipeline_mode = #tpu.pipeline_mode<synchronous>, transform_indices = @transform_6, window_bounds = array<i64: 2, 1>}, {transform_indices = @transform_7, window_bounds = array<i64: 2, 128>}]} {
    %c0 = arith.constant 0 : index
    %c0_0 = arith.constant 0 : index
    %0 = vector.load %arg1[%c0, %c0_0] : memref<4x128xf32, #tpu.memory_space<vmem>>, vector<4x128xf32>
    %c0_1 = arith.constant 0 : index
    %c0_2 = arith.constant 0 : index
    %1 = vector.load %arg2[%c0_1, %c0_2] : memref<32x4xf32, #tpu.memory_space<vmem>>, vector<32x4xf32>
    %cst = arith.constant dense<0.000000e+00> : vector<32x128xf32>
    %2 = tpu.matmul %1, %0, %cst {dimension_numbers = #tpu.dot_dimension_numbers<[1], [0], [0], [1], [0, 0, 1, 1], [], []>} : vector<32x4xf32>, vector<4x128xf32>, vector<32x128xf32> -> vector<32x128xf32>
    %c0_3 = arith.constant 0 : index
    %c0_4 = arith.constant 0 : index
    %3 = vector.load %arg3[%c0_3, %c0_4] : memref<32x1xf32, #tpu.memory_space<vmem>>, vector<32x1xf32>
    %4 = vector.broadcast %3 : vector<32x1xf32> to vector<32x128xf32>
    %5 = arith.addf %2, %4 : vector<32x128xf32>
    %cst_5 = arith.constant 0.000000e+00 : f32
    %6 = vector.broadcast %cst_5 : f32 to vector<32x128xf32>
    %7 = arith.maximumf %5, %6 : vector<32x128xf32>
    %c0_6 = arith.constant 0 : index
    %c0_7 = arith.constant 0 : index
    %8 = vector.load %arg4[%c0_6, %c0_7] : memref<32x32xf32, #tpu.memory_space<vmem>>, vector<32x32xf32>
    %cst_8 = arith.constant dense<0.000000e+00> : vector<32x128xf32>
    %9 = tpu.matmul %8, %7, %cst_8 {dimension_numbers = #tpu.dot_dimension_numbers<[1], [0], [0], [1], [0, 0, 1, 1], [], []>} : vector<32x32xf32>, vector<32x128xf32>, vector<32x128xf32> -> vector<32x128xf32>
    %c0_9 = arith.constant 0 : index
    %c0_10 = arith.constant 0 : index
    %10 = vector.load %arg5[%c0_9, %c0_10] : memref<32x1xf32, #tpu.memory_space<vmem>>, vector<32x1xf32>
    %11 = vector.broadcast %10 : vector<32x1xf32> to vector<32x128xf32>
    %12 = arith.addf %9, %11 : vector<32x128xf32>
    %cst_11 = arith.constant 0.000000e+00 : f32
    %13 = vector.broadcast %cst_11 : f32 to vector<32x128xf32>
    %14 = arith.maximumf %12, %13 : vector<32x128xf32>
    %c0_12 = arith.constant 0 : index
    %c0_13 = arith.constant 0 : index
    %15 = vector.load %arg6[%c0_12, %c0_13] : memref<2x32xf32, #tpu.memory_space<vmem>>, vector<2x32xf32>
    %cst_14 = arith.constant dense<0.000000e+00> : vector<2x128xf32>
    %16 = tpu.matmul %15, %14, %cst_14 {dimension_numbers = #tpu.dot_dimension_numbers<[1], [0], [0], [1], [0, 0, 1, 1], [], []>} : vector<2x32xf32>, vector<32x128xf32>, vector<2x128xf32> -> vector<2x128xf32>
    %c0_15 = arith.constant 0 : index
    %c0_16 = arith.constant 0 : index
    %17 = vector.load %arg7[%c0_15, %c0_16] : memref<2x1xf32, #tpu.memory_space<vmem>>, vector<2x1xf32>
    %18 = vector.broadcast %17 : vector<2x1xf32> to vector<2x128xf32>
    %19 = arith.addf %16, %18 : vector<2x128xf32>
    %cst_17 = arith.constant dense<0xFF800000> : vector<128xf32>
    %20 = vector.multi_reduction <maximumf>, %19, %cst_17 [0] : vector<2x128xf32> to vector<128xf32>
    %21 = vector.shape_cast %20 : vector<128xf32> to vector<1x128xf32>
    %22 = vector.broadcast %21 : vector<1x128xf32> to vector<2x128xf32>
    %23 = arith.subf %19, %22 : vector<2x128xf32>
    %24 = math.exp %23 : vector<2x128xf32>
    %cst_18 = arith.constant dense<0.000000e+00> : vector<128xf32>
    %25 = vector.multi_reduction <add>, %24, %cst_18 [0] : vector<2x128xf32> to vector<128xf32>
    %26 = vector.shape_cast %25 : vector<128xf32> to vector<1x128xf32>
    %27 = vector.broadcast %26 : vector<1x128xf32> to vector<2x128xf32>
    %28 = arith.divf %24, %27 : vector<2x128xf32>
    %c0_19 = arith.constant 0 : index
    %c0_20 = arith.constant 0 : index
    %29 = vector.load %arg8[%c0_19, %c0_20] : memref<2x128xf32, #tpu.memory_space<vmem>>, vector<2x128xf32>
    tpu.vector_store %arg8[%c0_19, %c0_20], %28 {strides = array<i32>} : memref<2x128xf32, #tpu.memory_space<vmem>>, vector<2x128xf32>,
    return
  }
  func.func @transform_0(%arg0: i32) -> (i32, i32) {
    %c0_i32 = arith.constant 0 : i32
    %c0_i32_0 = arith.constant 0 : i32
    return %c0_i32, %arg0 : i32, i32
  }
  func.func @transform_1(%arg0: i32) -> (i32, i32) {
    %c0_i32 = arith.constant 0 : i32
    %c0_i32_0 = arith.constant 0 : i32
    %c0_i32_1 = arith.constant 0 : i32
    return %c0_i32, %c0_i32_0 : i32, i32
  }
  func.func @transform_2(%arg0: i32) -> (i32, i32) {
    %c0_i32 = arith.constant 0 : i32
    %c0_i32_0 = arith.constant 0 : i32
    %c0_i32_1 = arith.constant 0 : i32
    return %c0_i32, %c0_i32_0 : i32, i32
  }
  func.func @transform_3(%arg0: i32) -> (i32, i32) {
    %c0_i32 = arith.constant 0 : i32
    %c0_i32_0 = arith.constant 0 : i32
    %c0_i32_1 = arith.constant 0 : i32
    return %c0_i32, %c0_i32_0 : i32, i32
  }
  func.func @transform_4(%arg0: i32) -> (i32, i32) {
    %c0_i32 = arith.constant 0 : i32
    %c0_i32_0 = arith.constant 0 : i32
    %c0_i32_1 = arith.constant 0 : i32
    return %c0_i32, %c0_i32_0 : i32, i32
  }
  func.func @transform_5(%arg0: i32) -> (i32, i32) {
    %c0_i32 = arith.constant 0 : i32
    %c0_i32_0 = arith.constant 0 : i32
    %c0_i32_1 = arith.constant 0 : i32
    return %c0_i32, %c0_i32_0 : i32, i32
  }
  func.func @transform_6(%arg0: i32) -> (i32, i32) {
    %c0_i32 = arith.constant 0 : i32
    %c0_i32_0 = arith.constant 0 : i32
    %c0_i32_1 = arith.constant 0 : i32
    return %c0_i32, %c0_i32_0 : i32, i32
  }
  func.func @transform_7(%arg0: i32) -> (i32, i32) {
    %c0_i32 = arith.constant 0 : i32
    %c0_i32_0 = arith.constant 0 : i32
    return %c0_i32, %arg0 : i32, i32
  }
}

</mosaic_0001>

<bundles_post_ra>
// kernel: net_forward.1
= control target key start
LH: loop header
LB: loop body
LE: loop exit
PB: predicated region body
PF: predicated region fallthrough
CT: control target
= control target key end

     0   :  { %vm68_vm0 = vcmask 1043456   ;;  %vm55_vm1 = vcmask 31744   ;;  %v481_v3 = vmov 0   ;;  %vm189_vm2 = vcmask 261120   ;;  %s594_s0 = inlined_call_operand.vmem [shape: f32[4,128], index: 0, kind: input, shape index: {}]   ;;  %s595_s1 = inlined_call_operand.vmem [shape: f32[32,4], index: 1, kind: input, shape index: {}]   ;;  %s596_s2 = inlined_call_operand.vmem [shape: f32[32,1], index: 2, kind: input, shape index: {}]   ;;  %s597_s4 = inlined_call_operand.vmem [shape: f32[32,1], index: 4, kind: input, shape index: {}]   ;;  %s598_s6 = inlined_call_operand.vmem [shape: f32[2,1], index: 6, kind: input, shape index: {}]   ;;  %s599_s3 = inlined_call_operand.vmem [shape: f32[32,32], index: 3, kind: input, shape index: {}]   ;;  %s600_s5 = inlined_call_operand.vmem [shape: f32[2,32], index: 5, kind: input, shape index: {}]   ;;  %s601_s7 = inlined_call_operand.vmem [shape: f32[2,128], index: 7, kind: output, shape index: {}]  }
   0x1   :  { %v26_v0 = vld [vmem:[%s594_s0] sm:$0xf]  ;;  %v28_v2 = vld [vmem:[%s595_s1 + $0x8] sm:$0xff]  ;;  %475 = vset.pattern.permute.xlu0 %v481_v3  ;;  %476 = vset.pattern.permute.xlu1 %v481_v3  ;;  %v29_v4 = vld [vmem:[%s595_s1 + $0x10] sm:$0xff]  ;;  %v482_v37 = vmov 0.0|0.0   ;;  %vm483_vm3 = vmmov 0  }
   0x2   :  { %v27_v1 = vld [vmem:[%s595_s1] sm:$0xff]  ;;  %424 = vmatprep.subr.msk.mxu0 %vm68_vm0, %v26_v0  ;;  %v33_v6 = vld [vmem:[%s596_s2 + $0x10] sm:$0xff]  ;;  %v32_v7 = vld [vmem:[%s596_s2 + $0x8] sm:$0xff]  ;;  %v484_v38 = vmov 0.0   ;;  %vm371_vm4 = vcmask 1041408  }
   0x3   :  { %426 = vmatprep.mubr.msk.f32.mxu0 %vm55_vm1, %v27_v1  ;;  %v31_v5 = vld [vmem:[%s596_s2] sm:$0xff]  ;;  %425 = vmatpush3.msk.msra.mxu0 %vm68_vm0, %v26_v0  ;;  %v30_v8 = vld [vmem:[%s595_s1 + $0x18] sm:$0xff]  ;;  %v166_v11 = vld [vmem:[%s597_s4 + $0x8] sm:$0xff] }
   0x4   :  { %37 = vperm.xlu0 %475, %v31_v5   ;;  %427 = vmatmul.mubr.msk.f32.vlgmr.msra.gmra.mrb[0].mxu0 %vm55_vm1, %v28_v2  ;;  %v34_v9 = vld [vmem:[%s596_s2 + $0x18] sm:$0xff]  ;;  %v165_v10 = vld [vmem:[%s597_s4] sm:$0xff]  ;;  %v167_v12 = vld [vmem:[%s597_s4 + $0x10] sm:$0xff] }
   0x5   :  { %47 = vperm.xlu1 %476, %v33_v6   ;;  %429 = vmatprep.mubr.msk.f32.mxu0 %vm55_vm1, %v29_v4  ;;  %v168_v13 = vld [vmem:[%s597_s4 + $0x18] sm:$0xff]  ;;  %v292_v14 = vld [vmem:[%s598_s6] sm:$0x3]  ;;  %v162_v34 = vld [vmem:[%s599_s3 + $0x8] sm:$0xff] }
   0x6   :  { %v161_v15 = vld [vmem:[%s599_s3] sm:$0xff]  ;;  %v163_v35 = vld [vmem:[%s599_s3 + $0x10] sm:$0xff]  ;;  %v164_v36 = vld [vmem:[%s599_s3 + $0x18] sm:$0xff]  ;;  %465 = vmatprep.subr.bf16.mxu0 %v482_v37 }
   0x7   :  { %440 = vmatprep.mubr.msk.f32.mxu1 %vm189_vm2, %v161_v15  ;;  %v291_v57 = vld [vmem:[%s600_s5] sm:$0x3] }
   0x8   :  { %42 = vperm.xlu0 %475, %v32_v7   ;;  %430 = vmatmul.mubr.msk.f32.gmra.mrb[2].mxu0 %vm55_vm1, %v30_v8 }
   0x9   :  { %52 = vperm.xlu1 %476, %v34_v9   ;;  %454 = vmatprep.mubr.msk.f32.mxu0 %vm483_vm3, %v484_v38 }
   0xc   :  { %171 = vperm.xlu0 %475, %v165_v10  }
   0xd   :  { %176 = vperm.xlu1 %476, %v166_v11  }
  0x10   :  { %181 = vperm.xlu0 %475, %v167_v12  }
  0x11   :  { %186 = vperm.xlu1 %476, %v168_v13  }
  0x14   :  { %295 = vperm.xlu0 %475, %v292_v14  }
  0x83   :  { %v38_v16 = vpop.permute.xlu0 %37 }
  0x84   :  { %v48_v17 = vpop.permute.xlu1 %47 }
  0x87   :  { %v43_v18 = vpop.permute.xlu0 %42 }
  0x88   :  { %v53_v24 = vpop.permute.xlu1 %52 }
  0x8b   :  { %v172_v40 = vpop.permute.xlu0 %171 }
  0x8c   :  { %v177_v39 = vpop.permute.xlu1 %176 }
  0x8f   :  { %v182_v49 = vpop.permute.xlu0 %181 }
  0x90   :  { %v187_v46 = vpop.permute.xlu1 %186 }
  0x93   :  { %v296_v58 = vpop.permute.xlu0 %295 }
  0xd7   :  { %v428_v19 = vpop.f32.mrb[0].mxu0 }
  0xd8   :  { %v144_v20 = vadd.f32 %v428_v19, %v43_v18  ;;  %v138_v21 = vpop.f32.mrb[1].mxu0 }
  0xd9   :  { %v139_v22 = vadd.f32 %v138_v21, %v38_v16 }
  0xda   :  { %v158_v23 = vmax.f32 %v144_v20, 0.0 }
  0xdb   :  { %v157_v25 = vmax.f32 %v139_v22, 0.0  ;;  %v431_v26 = vpop.f32.mrb[2].mxu0 }
  0xdc   :  { %v154_v27 = vadd.f32 %v431_v26, %v53_v24  ;;  %v148_v28 = vpop.f32.mrb[3].mxu0 }
  0xdd   :  { %v149_v29 = vadd.f32 %v148_v28, %v48_v17  ;;  %v457_v30 = vpack.c.bf16 %v158_v23, %v157_v25 }
  0xde   :  { %v160_v31 = vmax.f32 %v154_v27, 0.0 }
  0xdf   :  { %v159_v32 = vmax.f32 %v149_v29, 0.0  ;;  %458 = vmatprep.subr.bf16.mxu1 %v457_v30 }
  0xe0   :  { %460 = vmatpush3.bf16.msra.mxu1 %v457_v30 }
  0xe1   :  { %v461_v33 = vpack.c.bf16 %v160_v31, %v159_v32 }
  0xe3   :  { %462 = vmatprep.subr.bf16.mxu1 %v461_v33 }
  0xe4   :  { %464 = vmatpush3.bf16.msra.mxu1 %v461_v33 }
  0xe7   :  { %441 = vmatmul.mubr.msk.f32.vlgmr.msra.gmra.mrb[0].mxu1 %vm189_vm2, %v162_v34 }
  0xe8   :  { %443 = vmatprep.mubr.msk.f32.mxu1 %vm189_vm2, %v163_v35 }
  0xeb   :  { %444 = vmatmul.mubr.msk.f32.gmra.mrb[2].mxu1 %vm189_vm2, %v164_v36 }
 0x1ba   :  { %v442_v41 = vpop.f32.mrb[0].mxu1 }
 0x1bb   :  { %v274_v42 = vadd.f32 %v442_v41, %v177_v39  ;;  %v268_v43 = vpop.f32.mrb[1].mxu1 }
 0x1bc   :  { %v269_v44 = vadd.f32 %v268_v43, %v172_v40 }
 0x1bd   :  { %v288_v45 = vmax.f32 %v274_v42, 0.0 }
 0x1be   :  { %v287_v47 = vmax.f32 %v269_v44, 0.0  ;;  %v445_v48 = vpop.f32.mrb[2].mxu1 }
 0x1bf   :  { %v284_v50 = vadd.f32 %v445_v48, %v187_v46  ;;  %v278_v51 = vpop.f32.mrb[3].mxu1 }
 0x1c0   :  { %v466_v52 = vpack.c.bf16 %v288_v45, %v287_v47  ;;  %v279_v53 = vadd.f32 %v278_v51, %v182_v49 }
 0x1c1   :  { %v290_v54 = vmax.f32 %v284_v50, 0.0 }
 0x1c2   :  { %v289_v55 = vmax.f32 %v279_v53, 0.0  ;;  %467 = vmatpush3.bf16.msra.mxu0 %v466_v52 }
 0x1c3   :  { %468 = vmatprep.subr.bf16.mxu0 %v482_v37 }
 0x1c4   :  { %v469_v56 = vpack.c.bf16 %v290_v54, %v289_v55 }
 0x1c6   :  { %470 = vmatpush3.bf16.msra.mxu0 %v469_v56 }
 0x1c9   :  { %455 = vmatmul.mubr.msk.f32.vlgmr.msra.gmra.mrb[4].mxu0 %vm189_vm2, %v291_v57 }
 0x29c   :  { %v367_v59 = vpop.f32.mrb[4].mxu0 }
 0x29d   :  { %v368_v60 = vadd.f32 %v367_v59, %v296_v58  ;;  %v456_v61 = vpop.f32.mrb[5].mxu0 }
 0x29f   :  { %v372_v62 = vsel %vm371_vm4, %v368_v60, -inf }
 0x2a0   :  { %v373_v63 = vrot.slane %v372_v62, 4 }
 0x2a2   :  { %v374_v0 = vmax.f32 %v372_v62, %v373_v63 }
 0x2a4   :  { %v375_v1 = vrot.slane %v374_v0, 2 }
 0x2a6   :  { %v376_v2 = vmax.f32 %v374_v0, %v375_v1 }
 0x2a8   :  { %v377_v3 = vrot.slane %v376_v2, 1 }
 0x2aa   :  { %v378_v4 = vmax.f32 %v376_v2, %v377_v3 }
 0x2ac   :  { %v379_v5 = vsub.f32 %v368_v60, %v378_v4 }
 0x2ae   :  { %v380_v6 = vmul.f32 1.442695, %v379_v5 }
 0x2b0   :  { %477 = vpow2.f32 %v380_v6 }
 0x2ba   :  { %v478_v7 = vpop.eup %477 }
 0x2bb   :  { %v382_v8 = vsel %vm371_vm4, %v478_v7, 0.0 }
 0x2bc   :  { %v383_v9 = vrot.slane %v382_v8, 4 }
 0x2be   :  { %v384_v10 = vadd.f32 %v383_v9, %v382_v8 }
 0x2c0   :  { %v385_v11 = vrot.slane %v384_v10, 2 }
 0x2c2   :  { %v386_v12 = vadd.f32 %v385_v11, %v384_v10 }
 0x2c4   :  { %v387_v13 = vrot.slane %v386_v12, 1 }
 0x2c6   :  { %v388_v14 = vadd.f32 %v387_v13, %v386_v12 }
 0x2c8   :  { %479 = vrcp.f32 %v388_v14 }
 0x2d2   :  { %v480_v15 = vpop.eup %479 }
 0x2d3   :  { %v390_v16 = vmul.f32 %v480_v15, %v478_v7 }
 0x2d5   :  { %391 = vst [vmem:[%s601_s7] sm:$0x3] %v390_v16 }

</bundles_post_ra>
